<compile_context>
chip_gen: v7x
topology: tpu7x:2x2x1
jax: 0.10.0
libtpu: 0.0.40
codegen_flags: <defaults>
</compile_context>

<pallas_src>
import functools

import jax
import jax.numpy as jnp
from jax.experimental import pallas as pl
from jax.experimental.pallas import tpu as pltpu

_MIB = 1024 * 1024


# ---------------------------------------------------------------------------
# Small helpers
# ---------------------------------------------------------------------------
def _round_up(x, m):
    return (x + m - 1) // m * m


def _vmem_capacity_bytes():
    try:
        return int(pltpu.get_tpu_info().vmem_capacity_bytes)
    except Exception:
        return 64 * _MIB  # conservative fallback (v7x per-core VMEM)


def _choose_node_tiling(n, tile):
    """Padded node count n_p and a square node tile t with t | n_p."""
    n128 = _round_up(max(n, 1), 128)
    t = max((min(tile, n128) // 128) * 128, 128)
    n_p = _round_up(n128, t)
    # Prefer >= 2 row tiles (v7x shards the "parallel" axis across 2 TensorCores)
    # when it costs no extra padding.
    if n_p // t < 2 and t > 128:
        t_half = max(((t // 2) // 128) * 128, 128)
        if n_p % t_half == 0:
            t = t_half
    assert n_p % t == 0 and t % 128 == 0
    return n_p, t


def _layer_vmem_bytes(n_p, fin, fout, tm, tk, x_resident, has_w, out_itemsize):
    b = 2 * tm * tk * 2                                              # A tiles (bf16, 2-buf)
    b += (2 * n_p * fin * 2) if x_resident else (2 * tk * fin * 2)   # X
    if has_w:
        b += 2 * fin * fout * 2                                      # W (budget 2 buffers)
    b += tm * fin * 4                                                # f32 accumulator
    b += 2 * tm * fout * out_itemsize                                # output tiles
    return b


def _clamp_vmem_limit(bytes_needed, vmem_cap):
    cap = max(int(0.75 * vmem_cap), 32 * _MIB)
    return int(min(max(bytes_needed + 8 * _MIB, 32 * _MIB), cap))


# ---------------------------------------------------------------------------
# Kernels
# ---------------------------------------------------------------------------
def _agg_transform_kernel(a_ref, x_ref, w_ref, out_ref, acc_ref, *,
                          apply_relu, x_resident, tk):
    """Aggregate-first: acc += A_tile @ X_tile over k; last k: out = relu?(acc @ W)."""
    k = pl.program_id(1)

    @pl.when(k == 0)
    def _():
        acc_ref[...] = jnp.zeros_like(acc_ref)

    if x_resident:
        start = pl.multiple_of(k * tk, tk)
        x_blk = x_ref[pl.ds(start, tk), :]
    else:
        x_blk = x_ref[...]

    acc_ref[...] += jnp.dot(a_ref[...], x_blk, preferred_element_type=jnp.float32)

    @pl.when(k == pl.num_programs(1) - 1)
    def _():
        y = jnp.dot(acc_ref[...].astype(w_ref.dtype), w_ref[...],
                    preferred_element_type=jnp.float32)
        if apply_relu:
            y = jnp.maximum(y, 0.0)
        out_ref[...] = y.astype(out_ref.dtype)


def _agg_kernel(a_ref, x_ref, out_ref, acc_ref, *, apply_relu, x_resident, tk):
    """Transform-first path: X already = X@W; acc += A_tile @ X_tile; last: relu?(acc)."""
    k = pl.program_id(1)

    @pl.when(k == 0)
    def _():
        acc_ref[...] = jnp.zeros_like(acc_ref)

    if x_resident:
        start = pl.multiple_of(k * tk, tk)
        x_blk = x_ref[pl.ds(start, tk), :]
    else:
        x_blk = x_ref[...]

    acc_ref[...] += jnp.dot(a_ref[...], x_blk, preferred_element_type=jnp.float32)

    @pl.when(k == pl.num_programs(1) - 1)
    def _():
        y = acc_ref[...]
        if apply_relu:
            y = jnp.maximum(y, 0.0)
        out_ref[...] = y.astype(out_ref.dtype)


def _xw_kernel(x_ref, w_ref, out_ref):
    """Feature transform: out_tile = X_tile @ W (W VMEM-resident, constant index_map)."""
    out_ref[...] = jnp.dot(x_ref[...], w_ref[...],
                           preferred_element_type=jnp.float32).astype(out_ref.dtype)


# ---------------------------------------------------------------------------
# pallas_call wrappers
# ---------------------------------------------------------------------------
def _dense_matmul(x, w, *, tm, out_dtype, vmem_cap):
    """out = X @ W, tiled over node rows."""
    n_p, fin = x.shape
    fout = w.shape[1]
    out_isz = jnp.dtype(out_dtype).itemsize
    need = 2 * tm * fin * 2 + 2 * fin * fout * 2 + 2 * tm * fout * out_isz
    return pl.pallas_call(
        _xw_kernel,
        out_shape=jax.ShapeDtypeStruct((n_p, fout), out_dtype),
        grid_spec=pltpu.PrefetchScalarGridSpec(
            num_scalar_prefetch=0,
            grid=(n_p // tm,),
            in_specs=[pl.BlockSpec((tm, fin), lambda i: (i, 0)),
                      pl.BlockSpec((fin, fout), lambda i: (0, 0))],
            out_specs=pl.BlockSpec((tm, fout), lambda i: (i, 0)),
        ),
        compiler_params=pltpu.CompilerParams(
            dimension_semantics=("parallel",),
            vmem_limit_bytes=_clamp_vmem_limit(need, vmem_cap),
        ),
        cost_estimate=pl.CostEstimate(
            flops=2 * n_p * fin * fout, transcendentals=0,
            bytes_accessed=(x.size * x.dtype.itemsize + w.size * w.dtype.itemsize
                            + n_p * fout * out_isz)),
    )(x, w)


def _aggregate(a, x, w, *, apply_relu, out_dtype, tm, tk, x_resident, vmem_cap):
    """out = relu?((A @ X) [@ W]) with the source-node reduction as the last grid axis."""
    n_p = a.shape[0]
    fin = x.shape[1]
    has_w = w is not None
    fout = w.shape[1] if has_w else fin
    assert n_p % tm == 0 and n_p % tk == 0
    grid = (n_p // tm, n_p // tk)

    if x_resident:
        x_spec = pl.BlockSpec((n_p, fin), lambda i, k: (0, 0))   # fetched once
        x_reads = 1
    else:
        x_spec = pl.BlockSpec((tk, fin), lambda i, k: (k, 0))    # re-streamed per row tile
        x_reads = n_p // tm

    in_specs = [pl.BlockSpec((tm, tk), lambda i, k: (i, k)), x_spec]
    operands = [a, x]
    if has_w:
        # TODO(synk): mark W single-buffered (pipeline_mode=pl.Buffered(1)); constant
        # index_map means the second buffer is pure VMEM overhead on v7x.
        in_specs.append(pl.BlockSpec((fin, fout), lambda i, k: (0, 0)))
        operands.append(w)
        kernel = functools.partial(_agg_transform_kernel, apply_relu=apply_relu,
                                   x_resident=x_resident, tk=tk)
    else:
        kernel = functools.partial(_agg_kernel, apply_relu=apply_relu,
                                   x_resident=x_resident, tk=tk)

    out_isz = jnp.dtype(out_dtype).itemsize
    need = _layer_vmem_bytes(n_p, fin, fout, tm, tk, x_resident, has_w, out_isz)
    flops = 2 * n_p * n_p * fin + (2 * n_p * fin * fout if has_w else 0)
    bytes_accessed = (a.size * a.dtype.itemsize
                      + x.size * x.dtype.itemsize * x_reads
                      + (w.size * w.dtype.itemsize if has_w else 0)
                      + n_p * fout * out_isz)

    return pl.pallas_call(
        kernel,
        out_shape=jax.ShapeDtypeStruct((n_p, fout), out_dtype),
        grid_spec=pltpu.PrefetchScalarGridSpec(
            num_scalar_prefetch=0,
            grid=grid,
            in_specs=in_specs,
            out_specs=pl.BlockSpec((tm, fout), lambda i, k: (i, 0)),
            scratch_shapes=[pltpu.VMEM((tm, fin), jnp.float32)],
        ),
        compiler_params=pltpu.CompilerParams(
            dimension_semantics=("parallel", "arbitrary"),
            vmem_limit_bytes=_clamp_vmem_limit(need, vmem_cap),
        ),
        cost_estimate=pl.CostEstimate(
            flops=flops, transcendentals=0, bytes_accessed=bytes_accessed),
    )(*operands)


def _gcn_layer(a, x, w, *, apply_relu, out_dtype, tm, tk, vmem_cap, force_x_resident):
    """One GCNConv (+optional ReLU) on padded bf16 operands."""
    n_p = a.shape[0]
    fin = x.shape[1]
    fout = w.shape[1]

    if fout < fin:
        # Transform-first: aggregate at the narrower width Fout (cheaper MXU + HBM).
        x_eff = _dense_matmul(x, w, tm=tm, out_dtype=jnp.bfloat16, vmem_cap=vmem_cap)
        w_eff, width = None, fout
    else:
        # Aggregate-first, W applied once per row tile inside the kernel.
        x_eff, w_eff, width = x, w, fin

    if force_x_resident is None:
        cap = max(int(0.75 * vmem_cap), 32 * _MIB)
        resident_need = _layer_vmem_bytes(n_p, width, fout, tm, tk, True,
                                          w_eff is not None,
                                          jnp.dtype(out_dtype).itemsize)
        x_resident = resident_need <= cap
    else:
        x_resident = bool(force_x_resident)

    return _aggregate(a, x_eff, w_eff, apply_relu=apply_relu, out_dtype=out_dtype,
                      tm=tm, tk=tk, x_resident=x_resident, vmem_cap=vmem_cap)


# ---------------------------------------------------------------------------
# Glue: padded bf16 adjacency built directly from edge lists (plain JAX scatter)
# ---------------------------------------------------------------------------
def edges_to_padded_adj(edge_index, edge_weight, n_pad, dtype=jnp.bfloat16):
    """A[dst, src] += w, allocated directly at the padded shape / kernel dtype."""
    # TODO(synk): for large sparse graphs replace this dense O(N^2) adjacency with a
    # scalar-prefetch CSR gather kernel that streams only O(E) neighbor rows.
    src = edge_index[0]
    dst = edge_index[1]
    adj = jnp.zeros((n_pad, n_pad), dtype=dtype)
    return adj.at[dst, src].add(edge_weight.astype(dtype))


def _pad2(a, rows, cols, dtype):
    r, c = a.shape
    return jnp.pad(a, ((0, rows - r), (0, cols - c))).astype(dtype)


# ---------------------------------------------------------------------------
# Full forward (matches GCN_test.forward)
# ---------------------------------------------------------------------------
def gcn_forward(x, edge_index1, edge_index2, edge_weight1, edge_weight2, w1, w2,
                *, tile=512, force_x_resident=None):
    n, nfeat = x.shape
    nhid = w1.shape[1]
    nclass = w2.shape[1]

    n_p, t = _choose_node_tiling(n, tile)
    f_p = _round_up(nfeat, 128)
    h_p = _round_up(nhid, 128)
    c_p = _round_up(nclass, 128)
    vmem_cap = _vmem_capacity_bytes()

    bf16 = jnp.bfloat16
    x_p = _pad2(x, n_p, f_p, bf16)
    w1_p = _pad2(w1, f_p, h_p, bf16)
    w2_p = _pad2(w2, h_p, c_p, bf16)
    a1 = edges_to_padded_adj(edge_index1, edge_weight1, n_p, bf16)
    a2 = edges_to_padded_adj(edge_index2, edge_weight2, n_p, bf16)

    # Layer 1: relu(A1 @ (X @ W1))   (padded rows / cols stay exactly zero)
    h = _gcn_layer(a1, x_p, w1_p, apply_relu=True, out_dtype=bf16,
                   tm=t, tk=t, vmem_cap=vmem_cap, force_x_resident=force_x_resident)
    # Layer 2: A2 @ (h @ W2)
    out_p = _gcn_layer(a2, h, w2_p, apply_relu=False, out_dtype=jnp.float32,
                       tm=t, tk=t, vmem_cap=vmem_cap, force_x_resident=force_x_resident)
    return out_p[:n, :nclass]


# ---------------------------------------------------------------------------
# Pure-JAX f32 reference
# ---------------------------------------------------------------------------
def reference_forward(x, edge_index1, edge_index2, ew1, ew2, w1, w2):
    n = x.shape[0]

    def dense_adj(ei, ew):
        adj = jnp.zeros((n, n), dtype=jnp.float32)
        return adj.at[ei[1], ei[0]].add(ew.astype(jnp.float32))

    a1 = dense_adj(edge_index1, ew1)
    a2 = dense_adj(edge_index2, ew2)
    h = jnp.maximum(a1 @ (x @ w1), 0.0)
    return a2 @ (h @ w2)


if __name__ == "__main__":
    # Small deterministic problem. NFEAT pads to 256 > NHID's 128, so layer 1 exercises
    # the transform-first path; layer 2 exercises the fused aggregate-then-transform path.
    N = 64
    NFEAT = 200
    NHID = 32
    NCLASS = 8
    E = 256

    key = jax.random.PRNGKey(0)
    k_x, k_e1, k_e2, k_w1e, k_w2e, k_w1, k_w2 = jax.random.split(key, 7)

    x = jax.random.normal(k_x, (N, NFEAT), dtype=jnp.float32)
    edge_index1 = jax.random.randint(k_e1, (2, E), 0, N, dtype=jnp.int32)
    edge_index2 = jax.random.randint(k_e2, (2, E), 0, N, dtype=jnp.int32)
    edge_weight1 = jax.random.uniform(k_w1e, (E,), dtype=jnp.float32)
    edge_weight2 = jax.random.uniform(k_w2e, (E,), dtype=jnp.float32)
    w1 = jax.random.normal(k_w1, (NFEAT, NHID), dtype=jnp.float32) * 0.1
    w2 = jax.random.normal(k_w2, (NHID, NCLASS), dtype=jnp.float32) * 0.1

    args = (x, edge_index1, edge_index2, edge_weight1, edge_weight2, w1, w2)
    ref = reference_forward(*args)

    def check(out):
        assert out.shape == (N, NCLASS)
        err = float(jnp.max(jnp.abs(out - ref)) / (jnp.max(jnp.abs(ref)) + 1e-6))
        assert err < 5e-2, f"max relative error too large: {err}"

    # Default path: X held VMEM-resident when it fits the device's VMEM budget.
    out = jax.jit(gcn_forward)(*args)
    jax.block_until_ready(out)
    check(out)

    # Streaming-X path (what large graphs would use) must also be correct.
    out_stream = jax.jit(functools.partial(gcn_forward, force_x_resident=False))(*args)
    jax.block_until_ready(out_stream)
    check(out_stream)

    print("KERNEL_OK")
</pallas_src>

<mosaic_0001>
module attributes {stable_mosaic.version = 11 : i64} {
  func.func @_xw_kernel(%arg0: i32, %arg1: memref<128x256xbf16, #tpu.memory_space<vmem>>, %arg2: memref<256x128xbf16, #tpu.memory_space<vmem>>, %arg3: memref<128x128xbf16, #tpu.memory_space<vmem>>) attributes {dimension_semantics = [#tpu.dimension_semantics<parallel>], iteration_bounds = array<i64: 1>, scalar_prefetch = 0 : i64, scratch_operands = 0 : i64, tpu.core_type = #tpu.core_type<tc>, window_params = [{transform_indices = @transform_0, window_bounds = array<i64: 128, 256>}, {pipeline_mode = #tpu.pipeline_mode<synchronous>, transform_indices = @transform_1, window_bounds = array<i64: 256, 128>}, {transform_indices = @transform_2, window_bounds = array<i64: 128, 128>}]} {
    %c0 = arith.constant 0 : index
    %c0_0 = arith.constant 0 : index
    %0 = vector.load %arg1[%c0, %c0_0] : memref<128x256xbf16, #tpu.memory_space<vmem>>, vector<128x256xbf16>
    %c0_1 = arith.constant 0 : index
    %c0_2 = arith.constant 0 : index
    %1 = vector.load %arg2[%c0_1, %c0_2] : memref<256x128xbf16, #tpu.memory_space<vmem>>, vector<256x128xbf16>
    %cst = arith.constant dense<0.000000e+00> : vector<128x128xf32>
    %2 = tpu.matmul %0, %1, %cst {dimension_numbers = #tpu.dot_dimension_numbers<[1], [0], [0], [1], [0, 0, 1, 1], [], []>} : vector<128x256xbf16>, vector<256x128xbf16>, vector<128x128xf32> -> vector<128x128xf32>
    %3 = arith.truncf %2 : vector<128x128xf32> to vector<128x128xbf16>
    %c0_3 = arith.constant 0 : index
    %c0_4 = arith.constant 0 : index
    %4 = vector.load %arg3[%c0_3, %c0_4] : memref<128x128xbf16, #tpu.memory_space<vmem>>, vector<128x128xbf16>
    tpu.vector_store %arg3[%c0_3, %c0_4], %3 {strides = array<i32>} : memref<128x128xbf16, #tpu.memory_space<vmem>>, vector<128x128xbf16>,
    return
  }
  func.func @transform_0(%arg0: i32) -> (i32, i32) {
    %c0_i32 = arith.constant 0 : i32
    %c0_i32_0 = arith.constant 0 : i32
    return %arg0, %c0_i32 : i32, i32
  }
  func.func @transform_1(%arg0: i32) -> (i32, i32) {
    %c0_i32 = arith.constant 0 : i32
    %c0_i32_0 = arith.constant 0 : i32
    %c0_i32_1 = arith.constant 0 : i32
    return %c0_i32, %c0_i32_0 : i32, i32
  }
  func.func @transform_2(%arg0: i32) -> (i32, i32) {
    %c0_i32 = arith.constant 0 : i32
    %c0_i32_0 = arith.constant 0 : i32
    return %arg0, %c0_i32 : i32, i32
  }
}

module attributes {stable_mosaic.version = 11 : i64} {
  func.func @_agg_kernel(%arg0: i32, %arg1: i32, %arg2: memref<128x128xbf16, #tpu.memory_space<vmem>>, %arg3: memref<128x128xbf16, #tpu.memory_space<vmem>>, %arg4: memref<128x128xbf16, #tpu.memory_space<vmem>>, %arg5: memref<128x128xf32, #tpu.memory_space<vmem>>) attributes {dimension_semantics = [#tpu.dimension_semantics<parallel>, #tpu.dimension_semantics<arbitrary>], iteration_bounds = array<i64: 1, 1>, scalar_prefetch = 0 : i64, scratch_operands = 1 : i64, tpu.core_type = #tpu.core_type<tc>, window_params = [{transform_indices = @transform_0, window_bounds = array<i64: 128, 128>}, {pipeline_mode = #tpu.pipeline_mode<synchronous>, transform_indices = @transform_1, window_bounds = array<i64: 128, 128>}, {transform_indices = @transform_2, window_bounds = array<i64: 128, 128>}]} {
    %c0_i32 = arith.constant 0 : i32
    %0 = arith.cmpi eq, %arg1, %c0_i32 : i32
    %1 = arith.extui %0 : i1 to i32
    %c0_i32_0 = arith.constant 0 : i32
    %2 = arith.cmpi ne, %1, %c0_i32_0 : i32
    scf.if %2 {
      %cst_9 = arith.constant 0.000000e+00 : f32
      %15 = vector.broadcast %cst_9 : f32 to vector<128x128xf32>
      %c0_10 = arith.constant 0 : index
      %c0_11 = arith.constant 0 : index
      %16 = vector.load %arg5[%c0_10, %c0_11] : memref<128x128xf32, #tpu.memory_space<vmem>>, vector<128x128xf32>
      tpu.vector_store %arg5[%c0_10, %c0_11], %15 {strides = array<i32>} : memref<128x128xf32, #tpu.memory_space<vmem>>, vector<128x128xf32>,
    } else {
    }
    %c128_i32 = arith.constant 128 : i32
    %3 = arith.muli %arg1, %c128_i32 : i32
    %4 = tpu.assume_multiple %3, 128 : i32
    %5 = arith.index_cast %4 : i32 to index
    %c0 = arith.constant 0 : index
    %6 = vector.load %arg3[%5, %c0] : memref<128x128xbf16, #tpu.memory_space<vmem>>, vector<128x128xbf16>
    %c0_1 = arith.constant 0 : index
    %c0_2 = arith.constant 0 : index
    %7 = vector.load %arg5[%c0_1, %c0_2] : memref<128x128xf32, #tpu.memory_space<vmem>>, vector<128x128xf32>
    %c0_3 = arith.constant 0 : index
    %c0_4 = arith.constant 0 : index
    %8 = vector.load %arg2[%c0_3, %c0_4] : memref<128x128xbf16, #tpu.memory_space<vmem>>, vector<128x128xbf16>
    %cst = arith.constant dense<0.000000e+00> : vector<128x128xf32>
    %9 = tpu.matmul %8, %6, %cst {dimension_numbers = #tpu.dot_dimension_numbers<[1], [0], [0], [1], [0, 0, 1, 1], [], []>} : vector<128x128xbf16>, vector<128x128xbf16>, vector<128x128xf32> -> vector<128x128xf32>
    %10 = arith.addf %7, %9 : vector<128x128xf32>
    %c0_5 = arith.constant 0 : index
    %c0_6 = arith.constant 0 : index
    %11 = vector.load %arg5[%c0_5, %c0_6] : memref<128x128xf32, #tpu.memory_space<vmem>>, vector<128x128xf32>
    tpu.vector_store %arg5[%c0_5, %c0_6], %10 {strides = array<i32>} : memref<128x128xf32, #tpu.memory_space<vmem>>, vector<128x128xf32>,
    %c0_i32_7 = arith.constant 0 : i32
    %12 = arith.cmpi eq, %arg1, %c0_i32_7 : i32
    %13 = arith.extui %12 : i1 to i32
    %c0_i32_8 = arith.constant 0 : i32
    %14 = arith.cmpi ne, %13, %c0_i32_8 : i32
    scf.if %14 {
      %c0_9 = arith.constant 0 : index
      %c0_10 = arith.constant 0 : index
      %15 = vector.load %arg5[%c0_9, %c0_10] : memref<128x128xf32, #tpu.memory_space<vmem>>, vector<128x128xf32>
      %cst_11 = arith.constant 0.000000e+00 : f32
      %16 = vector.broadcast %cst_11 : f32 to vector<128x128xf32>
      %17 = arith.maximumf %15, %16 : vector<128x128xf32>
      %18 = arith.truncf %17 : vector<128x128xf32> to vector<128x128xbf16>
      %c0_12 = arith.constant 0 : index
      %c0_13 = arith.constant 0 : index
      %19 = vector.load %arg4[%c0_12, %c0_13] : memref<128x128xbf16, #tpu.memory_space<vmem>>, vector<128x128xbf16>
      tpu.vector_store %arg4[%c0_12, %c0_13], %18 {strides = array<i32>} : memref<128x128xbf16, #tpu.memory_space<vmem>>, vector<128x128xbf16>,
    } else {
    }
    return
  }
  func.func @transform_0(%arg0: i32, %arg1: i32) -> (i32, i32) {
    %c0_i32 = arith.constant 0 : i32
    return %arg0, %arg1 : i32, i32
  }
  func.func @transform_1(%arg0: i32, %arg1: i32) -> (i32, i32) {
    %c0_i32 = arith.constant 0 : i32
    %c0_i32_0 = arith.constant 0 : i32
    %c0_i32_1 = arith.constant 0 : i32
    return %c0_i32, %c0_i32_0 : i32, i32
  }
  func.func @transform_2(%arg0: i32, %arg1: i32) -> (i32, i32) {
    %c0_i32 = arith.constant 0 : i32
    %c0_i32_0 = arith.constant 0 : i32
    return %arg0, %c0_i32 : i32, i32
  }
}

module attributes {stable_mosaic.version = 11 : i64} {
  func.func @_agg_transform_kernel(%arg0: i32, %arg1: i32, %arg2: memref<128x128xbf16, #tpu.memory_space<vmem>>, %arg3: memref<128x128xbf16, #tpu.memory_space<vmem>>, %arg4: memref<128x128xbf16, #tpu.memory_space<vmem>>, %arg5: memref<128x128xf32, #tpu.memory_space<vmem>>, %arg6: memref<128x128xf32, #tpu.memory_space<vmem>>) attributes {dimension_semantics = [#tpu.dimension_semantics<parallel>, #tpu.dimension_semantics<arbitrary>], iteration_bounds = array<i64: 1, 1>, scalar_prefetch = 0 : i64, scratch_operands = 1 : i64, tpu.core_type = #tpu.core_type<tc>, window_params = [{transform_indices = @transform_0, window_bounds = array<i64: 128, 128>}, {pipeline_mode = #tpu.pipeline_mode<synchronous>, transform_indices = @transform_1, window_bounds = array<i64: 128, 128>}, {pipeline_mode = #tpu.pipeline_mode<synchronous>, transform_indices = @transform_2, window_bounds = array<i64: 128, 128>}, {transform_indices = @transform_3, window_bounds = array<i64: 128, 128>}]} {
    %c0_i32 = arith.constant 0 : i32
    %0 = arith.cmpi eq, %arg1, %c0_i32 : i32
    %1 = arith.extui %0 : i1 to i32
    %c0_i32_0 = arith.constant 0 : i32
    %2 = arith.cmpi ne, %1, %c0_i32_0 : i32
    scf.if %2 {
      %cst_9 = arith.constant 0.000000e+00 : f32
      %15 = vector.broadcast %cst_9 : f32 to vector<128x128xf32>
      %c0_10 = arith.constant 0 : index
      %c0_11 = arith.constant 0 : index
      %16 = vector.load %arg6[%c0_10, %c0_11] : memref<128x128xf32, #tpu.memory_space<vmem>>, vector<128x128xf32>
      tpu.vector_store %arg6[%c0_10, %c0_11], %15 {strides = array<i32>} : memref<128x128xf32, #tpu.memory_space<vmem>>, vector<128x128xf32>,
    } else {
    }
    %c128_i32 = arith.constant 128 : i32
    %3 = arith.muli %arg1, %c128_i32 : i32
    %4 = tpu.assume_multiple %3, 128 : i32
    %5 = arith.index_cast %4 : i32 to index
    %c0 = arith.constant 0 : index
    %6 = vector.load %arg3[%5, %c0] : memref<128x128xbf16, #tpu.memory_space<vmem>>, vector<128x128xbf16>
    %c0_1 = arith.constant 0 : index
    %c0_2 = arith.constant 0 : index
    %7 = vector.load %arg6[%c0_1, %c0_2] : memref<128x128xf32, #tpu.memory_space<vmem>>, vector<128x128xf32>
    %c0_3 = arith.constant 0 : index
    %c0_4 = arith.constant 0 : index
    %8 = vector.load %arg2[%c0_3, %c0_4] : memref<128x128xbf16, #tpu.memory_space<vmem>>, vector<128x128xbf16>
    %cst = arith.constant dense<0.000000e+00> : vector<128x128xf32>
    %9 = tpu.matmul %8, %6, %cst {dimension_numbers = #tpu.dot_dimension_numbers<[1], [0], [0], [1], [0, 0, 1, 1], [], []>} : vector<128x128xbf16>, vector<128x128xbf16>, vector<128x128xf32> -> vector<128x128xf32>
    %10 = arith.addf %7, %9 : vector<128x128xf32>
    %c0_5 = arith.constant 0 : index
    %c0_6 = arith.constant 0 : index
    %11 = vector.load %arg6[%c0_5, %c0_6] : memref<128x128xf32, #tpu.memory_space<vmem>>, vector<128x128xf32>
    tpu.vector_store %arg6[%c0_5, %c0_6], %10 {strides = array<i32>} : memref<128x128xf32, #tpu.memory_space<vmem>>, vector<128x128xf32>,
    %c0_i32_7 = arith.constant 0 : i32
    %12 = arith.cmpi eq, %arg1, %c0_i32_7 : i32
    %13 = arith.extui %12 : i1 to i32
    %c0_i32_8 = arith.constant 0 : i32
    %14 = arith.cmpi ne, %13, %c0_i32_8 : i32
    scf.if %14 {
      %c0_9 = arith.constant 0 : index
      %c0_10 = arith.constant 0 : index
      %15 = vector.load %arg6[%c0_9, %c0_10] : memref<128x128xf32, #tpu.memory_space<vmem>>, vector<128x128xf32>
      %16 = arith.truncf %15 : vector<128x128xf32> to vector<128x128xbf16>
      %c0_11 = arith.constant 0 : index
      %c0_12 = arith.constant 0 : index
      %17 = vector.load %arg4[%c0_11, %c0_12] : memref<128x128xbf16, #tpu.memory_space<vmem>>, vector<128x128xbf16>
      %cst_13 = arith.constant dense<0.000000e+00> : vector<128x128xf32>
      %18 = tpu.matmul %16, %17, %cst_13 {dimension_numbers = #tpu.dot_dimension_numbers<[1], [0], [0], [1], [0, 0, 1, 1], [], []>} : vector<128x128xbf16>, vector<128x128xbf16>, vector<128x128xf32> -> vector<128x128xf32>
      %c0_14 = arith.constant 0 : index
      %c0_15 = arith.constant 0 : index
      %19 = vector.load %arg5[%c0_14, %c0_15] : memref<128x128xf32, #tpu.memory_space<vmem>>, vector<128x128xf32>
      tpu.vector_store %arg5[%c0_14, %c0_15], %18 {strides = array<i32>} : memref<128x128xf32, #tpu.memory_space<vmem>>, vector<128x128xf32>,
    } else {
    }
    return
  }
  func.func @transform_0(%arg0: i32, %arg1: i32) -> (i32, i32) {
    %c0_i32 = arith.constant 0 : i32
    return %arg0, %arg1 : i32, i32
  }
  func.func @transform_1(%arg0: i32, %arg1: i32) -> (i32, i32) {
    %c0_i32 = arith.constant 0 : i32
    %c0_i32_0 = arith.constant 0 : i32
    %c0_i32_1 = arith.constant 0 : i32
    return %c0_i32, %c0_i32_0 : i32, i32
  }
  func.func @transform_2(%arg0: i32, %arg1: i32) -> (i32, i32) {
    %c0_i32 = arith.constant 0 : i32
    %c0_i32_0 = arith.constant 0 : i32
    %c0_i32_1 = arith.constant 0 : i32
    return %c0_i32, %c0_i32_0 : i32, i32
  }
  func.func @transform_3(%arg0: i32, %arg1: i32) -> (i32, i32) {
    %c0_i32 = arith.constant 0 : i32
    %c0_i32_0 = arith.constant 0 : i32
    return %arg0, %c0_i32 : i32, i32
  }
}

</mosaic_0001>

<bundles_post_ra>
// kernel: gcn_forward.4
= control target key start
LH: loop header
LB: loop body
LE: loop exit
PB: predicated region body
PF: predicated region fallthrough
CT: control target
= control target key end

     0   :  { %s693_s1 = inlined_call_operand.vmem [shape: bf16[128,128], index: 1, kind: input, shape index: {}]   ;;  %s694_s0 = inlined_call_operand.vmem [shape: bf16[128,128], index: 0, kind: input, shape index: {}]   ;;  %s695_s2 = inlined_call_operand.vmem [shape: bf16[128,128], index: 2, kind: output, shape index: {}]  }
   0x1   :  { %v590_v0 = vld [vmem:[%s693_s1] sm:$0xff]   ;;  %v591_v1 = vld [vmem:[%s693_s1 + $0x8] sm:$0xff]   ;;  %v592_v2 = vld [vmem:[%s693_s1 + $0x10] sm:$0xff]  }
   0x2   :  { %542 = vmatprep.subr.bf16.mxu0 %v590_v0  ;;  %574 = vmatprep.subr.bf16.mxu1 %v590_v0  ;;  %v593_v3 = vld [vmem:[%s693_s1 + $0x18] sm:$0xff]   ;;  %v598_v4 = vld [vmem:[%s694_s0] sm:$0xff]   ;;  %v595_v7 = vld [vmem:[%s693_s1 + $0x28] sm:$0xff]  }
   0x3   :  { %543 = vmatpush3.bf16.msra.mxu0 %v590_v0  ;;  %582 = vmatpush3.bf16.msra.mxu1 %v590_v0  ;;  %v599_v5 = vld [vmem:[%s694_s0 + $0x20] sm:$0xff]   ;;  %v596_v8 = vld [vmem:[%s693_s1 + $0x30] sm:$0xff]   ;;  %v597_v9 = vld [vmem:[%s693_s1 + $0x38] sm:$0xff]  }
   0x4   :  { %544 = vmatprep.subr.bf16.mxu0 %v591_v1  ;;  %575 = vmatprep.subr.bf16.mxu1 %v591_v1  ;;  %v594_v6 = vld [vmem:[%s693_s1 + $0x20] sm:$0xff]   ;;  %v600_v10 = vld [vmem:[%s694_s0 + $0x8] sm:$0xff]   ;;  %v602_v12 = vld [vmem:[%s694_s0 + $0x10] sm:$0xff]  }
   0x5   :  { %558 = vmatprep.mubr.bf16.mxu0 %v598_v4  ;;  %566 = vmatprep.mubr.bf16.mxu1 %v599_v5  ;;  %v601_v11 = vld [vmem:[%s694_s0 + $0x28] sm:$0xff]   ;;  %v603_v13 = vld [vmem:[%s694_s0 + $0x30] sm:$0xff]   ;;  %v604_v14 = vld [vmem:[%s694_s0 + $0x18] sm:$0xff]  }
   0x6   :  { %v605_v15 = vld [vmem:[%s694_s0 + $0x38] sm:$0xff]  }
   0x7   :  { %545 = vmatpush3.bf16.msra.mxu0 %v591_v1  ;;  %583 = vmatpush3.bf16.msra.mxu1 %v591_v1 }
   0x8   :  { %546 = vmatprep.subr.bf16.mxu0 %v592_v2  ;;  %576 = vmatprep.subr.bf16.mxu1 %v592_v2 }
   0xb   :  { %547 = vmatpush3.bf16.msra.mxu0 %v592_v2  ;;  %584 = vmatpush3.bf16.msra.mxu1 %v592_v2 }
   0xc   :  { %548 = vmatprep.subr.bf16.mxu0 %v593_v3  ;;  %577 = vmatprep.subr.bf16.mxu1 %v593_v3 }
   0xf   :  { %549 = vmatpush3.bf16.msra.mxu0 %v593_v3  ;;  %585 = vmatpush3.bf16.msra.mxu1 %v593_v3 }
  0x10   :  { %550 = vmatprep.subr.bf16.mxu0 %v594_v6  ;;  %578 = vmatprep.subr.bf16.mxu1 %v594_v6 }
  0x13   :  { %551 = vmatpush3.bf16.msra.mxu0 %v594_v6  ;;  %586 = vmatpush3.bf16.msra.mxu1 %v594_v6 }
  0x14   :  { %552 = vmatprep.subr.bf16.mxu0 %v595_v7  ;;  %579 = vmatprep.subr.bf16.mxu1 %v595_v7 }
  0x17   :  { %553 = vmatpush3.bf16.msra.mxu0 %v595_v7  ;;  %587 = vmatpush3.bf16.msra.mxu1 %v595_v7 }
  0x18   :  { %554 = vmatprep.subr.bf16.mxu0 %v596_v8  ;;  %580 = vmatprep.subr.bf16.mxu1 %v596_v8 }
  0x1b   :  { %555 = vmatpush3.bf16.msra.mxu0 %v596_v8  ;;  %588 = vmatpush3.bf16.msra.mxu1 %v596_v8 }
  0x1c   :  { %556 = vmatprep.subr.bf16.mxu0 %v597_v9  ;;  %581 = vmatprep.subr.bf16.mxu1 %v597_v9 }
  0x1f   :  { %557 = vmatpush3.bf16.msra.mxu0 %v597_v9  ;;  %589 = vmatpush3.bf16.msra.mxu1 %v597_v9 }
  0x22   :  { %559 = vmatmul.mubr.bf16.vlgmr.msra.gmra.mrb[0].mxu0 %v600_v10  ;;  %567 = vmatmul.mubr.bf16.vlgmr.msra.gmra.mrb[0].mxu1 %v601_v11 }
  0x23   :  { %562 = vmatprep.mubr.bf16.mxu0 %v602_v12  ;;  %570 = vmatprep.mubr.bf16.mxu1 %v603_v13 }
  0x2a   :  { %563 = vmatmul.mubr.bf16.gmra.mrb[4].mxu0 %v604_v14  ;;  %571 = vmatmul.mubr.bf16.gmra.mrb[4].mxu1 %v605_v15 }
  0xf5   :  { %v560_v16 = vpop.f32.mrb[0].mxu0  ;;  %v568_v17 = vpop.f32.mrb[0].mxu1 }
  0xf6   :  { %v215_v18 = vpop.f32.mrb[1].mxu0  ;;  %v247_v19 = vpop.f32.mrb[1].mxu1  ;;  %v331_v22 = vmax.f32 %v560_v16, 0.0  ;;  %v339_v23 = vmax.f32 %v568_v17, 0.0 }
  0xf7   :  { %v561_v20 = vpop.f32.mrb[2].mxu0  ;;  %v569_v21 = vpop.f32.mrb[2].mxu1  ;;  %v329_v28 = vmax.f32 %v215_v18, 0.0  ;;  %v337_v29 = vmax.f32 %v247_v19, 0.0 }
  0xf8   :  { %v332_v24 = vmax.f32 %v561_v20, 0.0  ;;  %v340_v25 = vmax.f32 %v569_v21, 0.0  ;;  %v218_v26 = vpop.f32.mrb[3].mxu0  ;;  %v250_v27 = vpop.f32.mrb[3].mxu1 }
  0xf9   :  { %v330_v30 = vmax.f32 %v218_v26, 0.0  ;;  %v338_v31 = vmax.f32 %v250_v27, 0.0 }
  0xfa   :  { %v487_v32 = vpack.c.bf16 %v332_v24, %v331_v22  ;;  %v507_v33 = vpack.c.bf16 %v340_v25, %v339_v23 }
  0xfb   :  { %v482_v34 = vpack.c.bf16 %v330_v30, %v329_v28  ;;  %v502_v35 = vpack.c.bf16 %v338_v31, %v337_v29 }
  0xfc   :  { %519 = vst [vmem:[%s695_s2 + $0x8] sm:$0xff] %v487_v32   ;;  %523 = vst [vmem:[%s695_s2 + $0x28] sm:$0xff] %v507_v33  }
  0xfd   :  { %483 = vst [vmem:[%s695_s2] sm:$0xff] %v482_v34   ;;  %522 = vst [vmem:[%s695_s2 + $0x20] sm:$0xff] %v502_v35   ;;  %v564_v36 = vpop.f32.mrb[4].mxu0  ;;  %v572_v37 = vpop.f32.mrb[4].mxu1 }
  0xfe   :  { %v231_v38 = vpop.f32.mrb[5].mxu0  ;;  %v263_v39 = vpop.f32.mrb[5].mxu1  ;;  %v335_v42 = vmax.f32 %v564_v36, 0.0  ;;  %v343_v43 = vmax.f32 %v572_v37, 0.0 }
  0xff   :  { %v565_v40 = vpop.f32.mrb[6].mxu0  ;;  %v573_v41 = vpop.f32.mrb[6].mxu1  ;;  %v333_v48 = vmax.f32 %v231_v38, 0.0  ;;  %v341_v49 = vmax.f32 %v263_v39, 0.0 }
 0x100   :  { %v336_v44 = vmax.f32 %v565_v40, 0.0  ;;  %v344_v45 = vmax.f32 %v573_v41, 0.0  ;;  %v234_v46 = vpop.f32.mrb[7].mxu0  ;;  %v266_v47 = vpop.f32.mrb[7].mxu1 }
 0x101   :  { %v334_v50 = vmax.f32 %v234_v46, 0.0  ;;  %v342_v51 = vmax.f32 %v266_v47, 0.0 }
 0x102   :  { %v497_v52 = vpack.c.bf16 %v336_v44, %v335_v42  ;;  %v517_v53 = vpack.c.bf16 %v344_v45, %v343_v43 }
 0x103   :  { %v492_v54 = vpack.c.bf16 %v334_v50, %v333_v48  ;;  %v512_v55 = vpack.c.bf16 %v342_v51, %v341_v49 }
 0x104   :  { %521 = vst [vmem:[%s695_s2 + $0x18] sm:$0xff] %v497_v52   ;;  %525 = vst [vmem:[%s695_s2 + $0x38] sm:$0xff] %v517_v53  }
 0x105   :  { %520 = vst [vmem:[%s695_s2 + $0x10] sm:$0xff] %v492_v54   ;;  %524 = vst [vmem:[%s695_s2 + $0x30] sm:$0xff] %v512_v55  }

// kernel: gcn_forward.3
= control target key start
LH: loop header
LB: loop body
LE: loop exit
PB: predicated region body
PF: predicated region fallthrough
CT: control target
= control target key end

     0   :  { %s783_s1 = inlined_call_operand.vmem [shape: bf16[256,128], index: 1, kind: input, shape index: {}]   ;;  %s784_s0 = inlined_call_operand.vmem [shape: bf16[128,256], index: 0, kind: input, shape index: {}]   ;;  %s785_s2 = inlined_call_operand.vmem [shape: bf16[128,128], index: 2, kind: output, shape index: {}]  }
   0x1   :  { %v608_v0 = vld [vmem:[%s783_s1 + $0x40] sm:$0xff]   ;;  %v610_v2 = vld [vmem:[%s783_s1 + $0x48] sm:$0xff]   ;;  %v612_v4 = vld [vmem:[%s783_s1 + $0x50] sm:$0xff]  }
   0x2   :  { %v609_v1 = vld [vmem:[%s783_s1] sm:$0xff]   ;;  %528 = vmatprep.subr.bf16.mxu0 %v608_v0  ;;  %592 = vmatprep.subr.bf16.mxu1 %v608_v0  ;;  %v611_v3 = vld [vmem:[%s783_s1 + $0x8] sm:$0xff]   ;;  %v613_v5 = vld [vmem:[%s783_s1 + $0x10] sm:$0xff]  }
   0x3   :  { %529 = vmatpush3.bf16.msra.mxu0 %v609_v1  ;;  %600 = vmatpush3.bf16.msra.mxu1 %v609_v1  ;;  %v614_v6 = vld [vmem:[%s783_s1 + $0x58] sm:$0xff]   ;;  %v616_v8 = vld [vmem:[%s783_s1 + $0x60] sm:$0xff]   ;;  %v618_v10 = vld [vmem:[%s783_s1 + $0x68] sm:$0xff]  }
   0x4   :  { %530 = vmatprep.subr.bf16.mxu0 %v610_v2  ;;  %593 = vmatprep.subr.bf16.mxu1 %v610_v2  ;;  %v615_v7 = vld [vmem:[%s783_s1 + $0x18] sm:$0xff]   ;;  %v617_v9 = vld [vmem:[%s783_s1 + $0x20] sm:$0xff]   ;;  %v619_v13 = vld [vmem:[%s783_s1 + $0x28] sm:$0xff]  }
   0x5   :  { %v626_v11 = vld [vmem:[%s784_s0 + $0x4] ss:$8 sps:$4 sm:$0xff]   ;;  %v620_v14 = vld [vmem:[%s783_s1 + $0x70] sm:$0xff]   ;;  %v622_v16 = vld [vmem:[%s783_s1 + $0x78] sm:$0xff]  }
   0x6   :  { %v629_v12 = vld [vmem:[%s784_s0 + $0x44] ss:$8 sps:$4 sm:$0xff]   ;;  %268 = vmatprep.mubr.bf16.mxu0 %v626_v11  ;;  %v621_v15 = vld [vmem:[%s783_s1 + $0x30] sm:$0xff]   ;;  %v623_v17 = vld [vmem:[%s783_s1 + $0x38] sm:$0xff]  }
   0x7   :  { %531 = vmatpush3.bf16.msra.mxu0 %v611_v3  ;;  %601 = vmatpush3.bf16.msra.mxu1 %v611_v3  ;;  %v624_v18 = vld [vmem:[%s784_s0] ss:$8 sps:$4 sm:$0xff]   ;;  %v630_v20 = vld [vmem:[%s784_s0 + $0x14] ss:$8 sps:$4 sm:$0xff]   ;;  %v634_v22 = vld [vmem:[%s784_s0 + $0x10] ss:$8 sps:$4 sm:$0xff]  }
   0x8   :  { %532 = vmatprep.subr.bf16.mxu0 %v612_v4  ;;  %594 = vmatprep.subr.bf16.mxu1 %v612_v4  ;;  %v627_v19 = vld [vmem:[%s784_s0 + $0x40] ss:$8 sps:$4 sm:$0xff]   ;;  %v632_v21 = vld [vmem:[%s784_s0 + $0x54] ss:$8 sps:$4 sm:$0xff]   ;;  %v635_v23 = vld [vmem:[%s784_s0 + $0x50] ss:$8 sps:$4 sm:$0xff]  }
   0x9   :  { %300 = vmatprep.mubr.bf16.mxu1 %v629_v12  ;;  %v636_v24 = vld [vmem:[%s784_s0 + $0x24] ss:$8 sps:$4 sm:$0xff]   ;;  %v640_v26 = vld [vmem:[%s784_s0 + $0x20] ss:$8 sps:$4 sm:$0xff]   ;;  %v642_v28 = vld [vmem:[%s784_s0 + $0x34] ss:$8 sps:$4 sm:$0xff]  }
   0xa   :  { %v638_v25 = vld [vmem:[%s784_s0 + $0x64] ss:$8 sps:$4 sm:$0xff]   ;;  %v641_v27 = vld [vmem:[%s784_s0 + $0x60] ss:$8 sps:$4 sm:$0xff]   ;;  %v644_v29 = vld [vmem:[%s784_s0 + $0x74] ss:$8 sps:$4 sm:$0xff]  }
   0xb   :  { %533 = vmatpush3.bf16.msra.mxu0 %v613_v5  ;;  %602 = vmatpush3.bf16.msra.mxu1 %v613_v5  ;;  %v646_v30 = vld [vmem:[%s784_s0 + $0x30] ss:$8 sps:$4 sm:$0xff]  }
   0xc   :  { %534 = vmatprep.subr.bf16.mxu0 %v614_v6  ;;  %595 = vmatprep.subr.bf16.mxu1 %v614_v6  ;;  %v647_v31 = vld [vmem:[%s784_s0 + $0x70] ss:$8 sps:$4 sm:$0xff]  }
   0xf   :  { %535 = vmatpush3.bf16.msra.mxu0 %v615_v7  ;;  %603 = vmatpush3.bf16.msra.mxu1 %v615_v7 }
  0x10   :  { %536 = vmatprep.subr.bf16.mxu0 %v616_v8  ;;  %596 = vmatprep.subr.bf16.mxu1 %v616_v8 }
  0x13   :  { %537 = vmatpush3.bf16.msra.mxu0 %v617_v9  ;;  %604 = vmatpush3.bf16.msra.mxu1 %v617_v9 }
  0x14   :  { %538 = vmatprep.subr.bf16.mxu0 %v618_v10  ;;  %597 = vmatprep.subr.bf16.mxu1 %v618_v10 }
  0x17   :  { %539 = vmatpush3.bf16.msra.mxu0 %v619_v13  ;;  %605 = vmatpush3.bf16.msra.mxu1 %v619_v13 }
  0x18   :  { %540 = vmatprep.subr.bf16.mxu0 %v620_v14  ;;  %598 = vmatprep.subr.bf16.mxu1 %v620_v14 }
  0x1b   :  { %541 = vmatpush3.bf16.msra.mxu0 %v621_v15  ;;  %606 = vmatpush3.bf16.msra.mxu1 %v621_v15 }
  0x1c   :  { %542 = vmatprep.subr.bf16.mxu0 %v622_v16  ;;  %599 = vmatprep.subr.bf16.mxu1 %v622_v16 }
  0x1f   :  { %543 = vmatpush3.bf16.msra.mxu0 %v623_v17  ;;  %607 = vmatpush3.bf16.msra.mxu1 %v623_v17 }
  0x22   :  { %269 = vmatmul.mubr.bf16.vlgmr.msra.gmra.mrb[0].mxu0 %v624_v18  ;;  %301 = vmatmul.mubr.bf16.vlgmr.msra.gmra.mrb[0].mxu1 %v627_v19 }
  0x23   :  { %276 = vmatprep.mubr.bf16.mxu0 %v630_v20  ;;  %308 = vmatprep.mubr.bf16.mxu1 %v632_v21 }
  0x2a   :  { %277 = vmatmul.mubr.bf16.gmra.mrb[4].mxu0 %v634_v22  ;;  %309 = vmatmul.mubr.bf16.gmra.mrb[4].mxu1 %v635_v23 }
  0x2b   :  { %284 = vmatprep.mubr.bf16.mxu0 %v636_v24  ;;  %316 = vmatprep.mubr.bf16.mxu1 %v638_v25 }
  0x32   :  { %285 = vmatmul.mubr.bf16.gmra.mrb[8].mxu0 %v640_v26  ;;  %317 = vmatmul.mubr.bf16.gmra.mrb[8].mxu1 %v641_v27 }
  0x33   :  { %292 = vmatprep.mubr.bf16.mxu0 %v642_v28  ;;  %324 = vmatprep.mubr.bf16.mxu1 %v644_v29 }
  0x3a   :  { %293 = vmatmul.mubr.bf16.gmra.mrb[12].mxu0 %v646_v30  ;;  %325 = vmatmul.mubr.bf16.gmra.mrb[12].mxu1 %v647_v31 }
  0xf5   :  { %v544_v32 = vpop.f32.mrb[0].mxu0  ;;  %v568_v33 = vpop.f32.mrb[0].mxu1 }
  0xf6   :  { %v545_v34 = vpop.f32.mrb[1].mxu0  ;;  %v569_v35 = vpop.f32.mrb[1].mxu1 }
  0xf7   :  { %v546_v36 = vadd.f32 %v545_v34, %v544_v32  ;;  %v570_v37 = vadd.f32 %v569_v35, %v568_v33  ;;  %v547_v38 = vpop.f32.mrb[2].mxu0  ;;  %v571_v39 = vpop.f32.mrb[2].mxu1 }
  0xf8   :  { %v548_v40 = vpop.f32.mrb[3].mxu0  ;;  %v572_v41 = vpop.f32.mrb[3].mxu1 }
  0xf9   :  { %v549_v42 = vadd.f32 %v548_v40, %v547_v38  ;;  %v573_v43 = vadd.f32 %v572_v41, %v571_v39 }
  0xfb   :  { %v484_v44 = vpack.c.bf16 %v549_v42, %v546_v36  ;;  %v504_v45 = vpack.c.bf16 %v573_v43, %v570_v37 }
  0xfd   :  { %485 = vst [vmem:[%s785_s2] sm:$0xff] %v484_v44   ;;  %524 = vst [vmem:[%s785_s2 + $0x20] sm:$0xff] %v504_v45   ;;  %v550_v46 = vpop.f32.mrb[4].mxu0  ;;  %v574_v47 = vpop.f32.mrb[4].mxu1 }
  0xfe   :  { %v551_v48 = vpop.f32.mrb[5].mxu0  ;;  %v575_v49 = vpop.f32.mrb[5].mxu1 }
  0xff   :  { %v552_v50 = vadd.f32 %v551_v48, %v550_v46  ;;  %v576_v51 = vadd.f32 %v575_v49, %v574_v47  ;;  %v553_v52 = vpop.f32.mrb[6].mxu0  ;;  %v577_v53 = vpop.f32.mrb[6].mxu1 }
 0x100   :  { %v554_v54 = vpop.f32.mrb[7].mxu0  ;;  %v578_v55 = vpop.f32.mrb[7].mxu1 }
 0x101   :  { %v555_v56 = vadd.f32 %v554_v54, %v553_v52  ;;  %v579_v57 = vadd.f32 %v578_v55, %v577_v53 }
 0x103   :  { %v489_v58 = vpack.c.bf16 %v555_v56, %v552_v50  ;;  %v509_v59 = vpack.c.bf16 %v579_v57, %v576_v51 }
 0x105   :  { %521 = vst [vmem:[%s785_s2 + $0x8] sm:$0xff] %v489_v58   ;;  %525 = vst [vmem:[%s785_s2 + $0x28] sm:$0xff] %v509_v59   ;;  %v556_v60 = vpop.f32.mrb[8].mxu0  ;;  %v580_v61 = vpop.f32.mrb[8].mxu1 }
 0x106   :  { %v557_v62 = vpop.f32.mrb[9].mxu0  ;;  %v581_v63 = vpop.f32.mrb[9].mxu1 }
 0x107   :  { %v558_v0 = vadd.f32 %v557_v62, %v556_v60  ;;  %v582_v1 = vadd.f32 %v581_v63, %v580_v61  ;;  %v559_v2 = vpop.f32.mrb[10].mxu0  ;;  %v583_v3 = vpop.f32.mrb[10].mxu1 }
 0x108   :  { %v560_v4 = vpop.f32.mrb[11].mxu0  ;;  %v584_v5 = vpop.f32.mrb[11].mxu1 }
 0x109   :  { %v561_v6 = vadd.f32 %v560_v4, %v559_v2  ;;  %v585_v7 = vadd.f32 %v584_v5, %v583_v3 }
 0x10b   :  { %v494_v8 = vpack.c.bf16 %v561_v6, %v558_v0  ;;  %v514_v9 = vpack.c.bf16 %v585_v7, %v582_v1 }
 0x10d   :  { %522 = vst [vmem:[%s785_s2 + $0x10] sm:$0xff] %v494_v8   ;;  %526 = vst [vmem:[%s785_s2 + $0x30] sm:$0xff] %v514_v9   ;;  %v562_v10 = vpop.f32.mrb[12].mxu0  ;;  %v586_v11 = vpop.f32.mrb[12].mxu1 }
 0x10e   :  { %v563_v12 = vpop.f32.mrb[13].mxu0  ;;  %v587_v13 = vpop.f32.mrb[13].mxu1 }
 0x10f   :  { %v564_v14 = vadd.f32 %v563_v12, %v562_v10  ;;  %v588_v15 = vadd.f32 %v587_v13, %v586_v11  ;;  %v565_v16 = vpop.f32.mrb[14].mxu0  ;;  %v589_v17 = vpop.f32.mrb[14].mxu1 }
 0x110   :  { %v566_v18 = vpop.f32.mrb[15].mxu0  ;;  %v590_v19 = vpop.f32.mrb[15].mxu1 }
 0x111   :  { %v567_v20 = vadd.f32 %v566_v18, %v565_v16  ;;  %v591_v21 = vadd.f32 %v590_v19, %v589_v17 }
 0x113   :  { %v499_v22 = vpack.c.bf16 %v567_v20, %v564_v14  ;;  %v519_v23 = vpack.c.bf16 %v591_v21, %v588_v15 }
 0x115   :  { %523 = vst [vmem:[%s785_s2 + $0x18] sm:$0xff] %v499_v22   ;;  %527 = vst [vmem:[%s785_s2 + $0x38] sm:$0xff] %v519_v23  }

// kernel: gcn_forward.5
= control target key start
LH: loop header
LB: loop body
LE: loop exit
PB: predicated region body
PF: predicated region fallthrough
CT: control target
= control target key end

     0   :  { %s807_s1 = inlined_call_operand.vmem [shape: bf16[128,128], index: 1, kind: input, shape index: {}]   ;;  %s808_s0 = inlined_call_operand.vmem [shape: bf16[128,128], index: 0, kind: input, shape index: {}]   ;;  %s809_s2 = inlined_call_operand.vmem [shape: bf16[128,128], index: 2, kind: input, shape index: {}]   ;;  %s810_s3 = inlined_call_operand.vmem [shape: f32[128,128], index: 3, kind: output, shape index: {}]  }
   0x1   :  { %v643_v0 = vld [vmem:[%s807_s1] sm:$0xff]   ;;  %v644_v1 = vld [vmem:[%s807_s1 + $0x8] sm:$0xff]   ;;  %v645_v2 = vld [vmem:[%s807_s1 + $0x10] sm:$0xff]  }
   0x2   :  { %579 = vmatprep.subr.bf16.mxu0 %v643_v0  ;;  %v646_v3 = vld [vmem:[%s807_s1 + $0x18] sm:$0xff]   ;;  %v651_v4 = vld [vmem:[%s808_s0] sm:$0xff]   ;;  %v648_v6 = vld [vmem:[%s807_s1 + $0x28] sm:$0xff]  }
   0x3   :  { %580 = vmatpush3.bf16.msra.mxu0 %v643_v0  ;;  %595 = vmatprep.mubr.bf16.mxu0 %v651_v4  ;;  %v647_v5 = vld [vmem:[%s807_s1 + $0x20] sm:$0xff]   ;;  %v660_v8 = vld [vmem:[%s809_s2 + $0x8] sm:$0xff]   ;;  %v649_v9 = vld [vmem:[%s807_s1 + $0x30] sm:$0xff]  }
   0x4   :  { %581 = vmatprep.subr.bf16.mxu0 %v644_v1  ;;  %v659_v7 = vld [vmem:[%s809_s2] sm:$0xff]   ;;  %v661_v10 = vld [vmem:[%s809_s2 + $0x10] sm:$0xff]   ;;  %v650_v11 = vld [vmem:[%s807_s1 + $0x38] sm:$0xff]  }
   0x5   :  { %611 = vmatprep.subr.bf16.mxu1 %v659_v7  ;;  %v662_v12 = vld [vmem:[%s809_s2 + $0x18] sm:$0xff]   ;;  %v663_v13 = vld [vmem:[%s809_s2 + $0x20] sm:$0xff]   ;;  %v652_v14 = vld [vmem:[%s808_s0 + $0x8] sm:$0xff]  }
   0x6   :  { %612 = vmatpush3.bf16.msra.mxu1 %v659_v7  ;;  %v653_v15 = vld [vmem:[%s808_s0 + $0x10] sm:$0xff]   ;;  %v664_v16 = vld [vmem:[%s809_s2 + $0x28] sm:$0xff]   ;;  %v654_v18 = vld [vmem:[%s808_s0 + $0x18] sm:$0xff]  }
   0x7   :  { %582 = vmatpush3.bf16.msra.mxu0 %v644_v1  ;;  %613 = vmatprep.subr.bf16.mxu1 %v660_v8  ;;  %v665_v17 = vld [vmem:[%s809_s2 + $0x30] sm:$0xff]   ;;  %v655_v19 = vld [vmem:[%s808_s0 + $0x20] sm:$0xff]   ;;  %v656_v20 = vld [vmem:[%s808_s0 + $0x28] sm:$0xff]  }
   0x8   :  { %583 = vmatprep.subr.bf16.mxu0 %v645_v2  ;;  %v657_v21 = vld [vmem:[%s808_s0 + $0x30] sm:$0xff]   ;;  %v658_v22 = vld [vmem:[%s808_s0 + $0x38] sm:$0xff]  }
   0x9   :  { %v666_v23 = vld [vmem:[%s809_s2 + $0x38] sm:$0xff]  }
   0xa   :  { %614 = vmatpush3.bf16.msra.mxu1 %v660_v8 }
   0xb   :  { %584 = vmatpush3.bf16.msra.mxu0 %v645_v2  ;;  %615 = vmatprep.subr.bf16.mxu1 %v661_v10 }
   0xc   :  { %585 = vmatprep.subr.bf16.mxu0 %v646_v3 }
   0xe   :  { %616 = vmatpush3.bf16.msra.mxu1 %v661_v10 }
   0xf   :  { %586 = vmatpush3.bf16.msra.mxu0 %v646_v3  ;;  %617 = vmatprep.subr.bf16.mxu1 %v662_v12 }
  0x10   :  { %587 = vmatprep.subr.bf16.mxu0 %v647_v5 }
  0x12   :  { %618 = vmatpush3.bf16.msra.mxu1 %v662_v12 }
  0x13   :  { %588 = vmatpush3.bf16.msra.mxu0 %v647_v5  ;;  %619 = vmatprep.subr.bf16.mxu1 %v663_v13 }
  0x14   :  { %589 = vmatprep.subr.bf16.mxu0 %v648_v6 }
  0x16   :  { %620 = vmatpush3.bf16.msra.mxu1 %v663_v13 }
  0x17   :  { %590 = vmatpush3.bf16.msra.mxu0 %v648_v6  ;;  %621 = vmatprep.subr.bf16.mxu1 %v664_v16 }
  0x18   :  { %591 = vmatprep.subr.bf16.mxu0 %v649_v9 }
  0x1a   :  { %622 = vmatpush3.bf16.msra.mxu1 %v664_v16 }
  0x1b   :  { %592 = vmatpush3.bf16.msra.mxu0 %v649_v9  ;;  %623 = vmatprep.subr.bf16.mxu1 %v665_v17 }
  0x1c   :  { %593 = vmatprep.subr.bf16.mxu0 %v650_v11 }
  0x1e   :  { %624 = vmatpush3.bf16.msra.mxu1 %v665_v17 }
  0x1f   :  { %594 = vmatpush3.bf16.msra.mxu0 %v650_v11  ;;  %625 = vmatprep.subr.bf16.mxu1 %v666_v23 }
  0x22   :  { %596 = vmatmul.mubr.bf16.vlgmr.msra.gmra.mrb[0].mxu0 %v652_v14  ;;  %626 = vmatpush3.bf16.msra.mxu1 %v666_v23 }
  0x23   :  { %599 = vmatprep.mubr.bf16.mxu0 %v653_v15 }
  0x2a   :  { %600 = vmatmul.mubr.bf16.gmra.mrb[4].mxu0 %v654_v18 }
  0x2b   :  { %603 = vmatprep.mubr.bf16.mxu0 %v655_v19 }
  0x32   :  { %604 = vmatmul.mubr.bf16.gmra.mrb[8].mxu0 %v656_v20 }
  0x33   :  { %607 = vmatprep.mubr.bf16.mxu0 %v657_v21 }
  0x3a   :  { %608 = vmatmul.mubr.bf16.gmra.mrb[12].mxu0 %v658_v22 }
  0xf5   :  { %v597_v24 = vpop.f32.mrb[0].mxu0 }
  0xf6   :  { %v218_v25 = vpop.f32.mrb[1].mxu0 }
  0xf7   :  { %v598_v26 = vpop.f32.mrb[2].mxu0 }
  0xf8   :  { %v333_v27 = vpack.c.bf16 %v598_v26, %v597_v24  ;;  %v221_v28 = vpop.f32.mrb[3].mxu0 }
  0xf9   :  { %v332_v29 = vpack.c.bf16 %v221_v28, %v218_v25 }
  0xfb   :  { %627 = vmatprep.mubr.bf16.mxu1 %v332_v29 }
  0xfc   :  { %628 = vmatmul.mubr.bf16.vlgmr.msra.gmra.mrb[0].mxu1 %v333_v27 }
  0xfd   :  { %v601_v30 = vpop.f32.mrb[4].mxu0 }
  0xfe   :  { %v234_v31 = vpop.f32.mrb[5].mxu0 }
  0xff   :  { %v602_v32 = vpop.f32.mrb[6].mxu0 }
 0x100   :  { %v335_v33 = vpack.c.bf16 %v602_v32, %v601_v30  ;;  %v237_v34 = vpop.f32.mrb[7].mxu0 }
 0x101   :  { %v334_v35 = vpack.c.bf16 %v237_v34, %v234_v31 }
 0x103   :  { %631 = vmatprep.mubr.bf16.mxu1 %v334_v35 }
 0x104   :  { %632 = vmatmul.mubr.bf16.gmra.mrb[4].mxu1 %v335_v33 }
 0x105   :  { %v605_v36 = vpop.f32.mrb[8].mxu0 }
 0x106   :  { %v250_v37 = vpop.f32.mrb[9].mxu0 }
 0x107   :  { %v606_v38 = vpop.f32.mrb[10].mxu0 }
 0x108   :  { %v337_v39 = vpack.c.bf16 %v606_v38, %v605_v36  ;;  %v253_v40 = vpop.f32.mrb[11].mxu0 }
 0x109   :  { %v336_v41 = vpack.c.bf16 %v253_v40, %v250_v37 }
 0x10b   :  { %635 = vmatprep.mubr.bf16.mxu1 %v336_v41 }
 0x10c   :  { %636 = vmatmul.mubr.bf16.gmra.mrb[8].mxu1 %v337_v39 }
 0x10d   :  { %v609_v42 = vpop.f32.mrb[12].mxu0 }
 0x10e   :  { %v266_v43 = vpop.f32.mrb[13].mxu0 }
 0x10f   :  { %v610_v44 = vpop.f32.mrb[14].mxu0 }
 0x110   :  { %v339_v45 = vpack.c.bf16 %v610_v44, %v609_v42  ;;  %v269_v46 = vpop.f32.mrb[15].mxu0 }
 0x111   :  { %v338_v47 = vpack.c.bf16 %v269_v46, %v266_v43 }
 0x113   :  { %639 = vmatprep.mubr.bf16.mxu1 %v338_v47 }
 0x114   :  { %640 = vmatmul.mubr.bf16.gmra.mrb[12].mxu1 %v339_v45 }
 0x1cf   :  { %v629_v48 = vpop.f32.mrb[0].mxu1 }
 0x1d0   :  { %503 = vst [vmem:[%s810_s3 + $0x10] sm:$0xff] %v629_v48  ;;  %v438_v49 = vpop.f32.mrb[1].mxu1 }
 0x1d1   :  { %501 = vst [vmem:[%s810_s3] sm:$0xff] %v438_v49  ;;  %v630_v50 = vpop.f32.mrb[2].mxu1 }
 0x1d2   :  { %504 = vst [vmem:[%s810_s3 + $0x18] sm:$0xff] %v630_v50  ;;  %v441_v51 = vpop.f32.mrb[3].mxu1 }
 0x1d3   :  { %502 = vst [vmem:[%s810_s3 + $0x8] sm:$0xff] %v441_v51 }
 0x1d7   :  { %v633_v52 = vpop.f32.mrb[4].mxu1 }
 0x1d8   :  { %507 = vst [vmem:[%s810_s3 + $0x30] sm:$0xff] %v633_v52  ;;  %v454_v53 = vpop.f32.mrb[5].mxu1 }
 0x1d9   :  { %505 = vst [vmem:[%s810_s3 + $0x20] sm:$0xff] %v454_v53  ;;  %v634_v54 = vpop.f32.mrb[6].mxu1 }
 0x1da   :  { %508 = vst [vmem:[%s810_s3 + $0x38] sm:$0xff] %v634_v54  ;;  %v457_v55 = vpop.f32.mrb[7].mxu1 }
 0x1db   :  { %506 = vst [vmem:[%s810_s3 + $0x28] sm:$0xff] %v457_v55 }
 0x1df   :  { %v637_v56 = vpop.f32.mrb[8].mxu1 }
 0x1e0   :  { %511 = vst [vmem:[%s810_s3 + $0x50] sm:$0xff] %v637_v56  ;;  %v470_v57 = vpop.f32.mrb[9].mxu1 }
 0x1e1   :  { %509 = vst [vmem:[%s810_s3 + $0x40] sm:$0xff] %v470_v57  ;;  %v638_v58 = vpop.f32.mrb[10].mxu1 }
 0x1e2   :  { %512 = vst [vmem:[%s810_s3 + $0x58] sm:$0xff] %v638_v58  ;;  %v473_v59 = vpop.f32.mrb[11].mxu1 }
 0x1e3   :  { %510 = vst [vmem:[%s810_s3 + $0x48] sm:$0xff] %v473_v59 }
 0x1e7   :  { %v641_v60 = vpop.f32.mrb[12].mxu1 }
 0x1e8   :  { %515 = vst [vmem:[%s810_s3 + $0x70] sm:$0xff] %v641_v60  ;;  %v486_v61 = vpop.f32.mrb[13].mxu1 }
 0x1e9   :  { %513 = vst [vmem:[%s810_s3 + $0x60] sm:$0xff] %v486_v61  ;;  %v642_v62 = vpop.f32.mrb[14].mxu1 }
 0x1ea   :  { %516 = vst [vmem:[%s810_s3 + $0x78] sm:$0xff] %v642_v62  ;;  %v489_v63 = vpop.f32.mrb[15].mxu1 }
 0x1eb   :  { %514 = vst [vmem:[%s810_s3 + $0x68] sm:$0xff] %v489_v63 }

</bundles_post_ra>
